<compile_context>
chip_gen: v7x
topology: tpu7x:2x2x1
jax: 0.10.0
libtpu: 0.0.40
codegen_flags: <defaults>
</compile_context>

<pallas_src>
import jax
import jax.numpy as jnp
from jax.experimental import pallas as pl
from jax.experimental.pallas import tpu as pltpu

L1_SIZE = 16
L2_SIZE = 8


def _sigmoid(z):
    # sigmoid(z) == 0.5 * (tanh(z / 2) + 1): one EUP tanh + one VALU op,
    # instead of exp + add + exact divide (Newton iterations on the VPU).
    return 0.5 * jnp.tanh(0.5 * z) + 0.5


def rencoder_kernel(x_ref, w1_ref, b1_ref, w2_ref, b2_ref, w3_ref, b3_ref,
                    out_ref):
    # Lane-major layout: rows on lanes, features on sublanes.
    x = x_ref[...]                                          # (in_dim, tile_n)

    # All three layers on the MXU with f32 accumulation; biases (f, 1)
    # broadcast along lanes.  K is tiny (in_dim/16/8) but the MXU/extended
    # slot is otherwise idle, so this is cheaper than VPU broadcast-FMAs.
    h1 = _sigmoid(
        jnp.dot(w1_ref[...], x, preferred_element_type=jnp.float32)
        + b1_ref[...])                                      # (16, tile_n)
    h2 = _sigmoid(
        jnp.dot(w2_ref[...], h1, preferred_element_type=jnp.float32)
        + b2_ref[...])                                      # (8, tile_n)
    out_ref[...] = (
        jnp.dot(w3_ref[...], h2, preferred_element_type=jnp.float32)
        + b3_ref[...]).astype(out_ref.dtype)                # (out_dim, tile_n)


def rencoder_forward_t(x_t, params, *, tile_n=8192):
    """Transposed-layout entry: x_t (in_dim, N) f32 -> (out_dim, N) f32."""
    w1, b1, w2, b2, w3, b3 = params
    in_dim, N = x_t.shape
    out_dim = w3.shape[0]

    # Row tile: multiple of 128 (lane width).  Large tiles amortize the
    # per-grid-step pipeline overhead; keep >= 2 steps whenever N > 128 so
    # the "parallel" grid axis shards across both v7x TensorCores (free on
    # v5e/v6e, which have a single TC).
    tile_n = max(128, (int(tile_n) // 128) * 128)
    if N > 128:
        half = pl.cdiv(pl.cdiv(N, 2), 128) * 128
        tile_n = min(tile_n, half)
    else:
        tile_n = 128
    grid = (pl.cdiv(N, tile_n),)   # un-padded grid; Pallas masks edge blocks.

    def rep(a):                    # tiny whole-array blocks, resident across grid
        return pl.BlockSpec(a.shape, lambda i: (0, 0))

    return pl.pallas_call(
        rencoder_kernel,
        out_shape=jax.ShapeDtypeStruct((out_dim, N), jnp.float32),
        grid=grid,
        in_specs=[
            pl.BlockSpec((in_dim, tile_n), lambda i: (0, i)),   # rows on lanes
            rep(w1), rep(b1), rep(w2), rep(b2), rep(w3), rep(b3),
        ],
        out_specs=pl.BlockSpec((out_dim, tile_n), lambda i: (0, i)),
        compiler_params=pltpu.CompilerParams(
            dimension_semantics=("parallel",)),
    )(x_t, w1, b1, w2, b2, w3, b3)


def rencoder_forward(x, params, *, tile_n=8192):
    """PyTorch-layout entry: x (N, in_dim) -> (N, out_dim) == REncoder(x)."""
    x_t = x.astype(jnp.float32).T          # single layout pass, no pad copy
    return rencoder_forward_t(x_t, params, tile_n=tile_n).T


def init_params(key, in_dim, out_dim):
    """Weights ~ normal (init_func=normal_), biases ~ PyTorch-Linear-style."""
    ks = jax.random.split(key, 6)
    w1 = jax.random.normal(ks[0], (L1_SIZE, in_dim), jnp.float32)
    b1 = (jax.random.uniform(ks[1], (L1_SIZE, 1), jnp.float32) - 0.5) \
        * 2.0 / jnp.sqrt(in_dim)
    w2 = jax.random.normal(ks[2], (L2_SIZE, L1_SIZE), jnp.float32)
    b2 = (jax.random.uniform(ks[3], (L2_SIZE, 1), jnp.float32) - 0.5) \
        * 2.0 / jnp.sqrt(L1_SIZE)
    w3 = jax.random.normal(ks[4], (out_dim, L2_SIZE), jnp.float32)
    b3 = (jax.random.uniform(ks[5], (out_dim, 1), jnp.float32) - 0.5) \
        * 2.0 / jnp.sqrt(L2_SIZE)
    return (w1, b1, w2, b2, w3, b3)


def rencoder_ref(x, params):
    """Pure-JAX reference mirroring the PyTorch forward (f32-exact matmuls)."""
    w1, b1, w2, b2, w3, b3 = params
    hi = jax.lax.Precision.HIGHEST
    h1 = jax.nn.sigmoid(jnp.dot(x, w1.T, precision=hi) + b1[:, 0])
    h2 = jax.nn.sigmoid(jnp.dot(h1, w2.T, precision=hi) + b2[:, 0])
    return jnp.dot(h2, w3.T, precision=hi) + b3[:, 0]


if __name__ == "__main__":
    key = jax.random.PRNGKey(0)
    k_x, k_p = jax.random.split(key)

    # REncoder encodes (x_i, y_i) pairs: in_dim = x_dim + y_dim = 3; r_dim = 8.
    N, in_dim, out_dim = 16, 3, 8
    x = jax.random.normal(k_x, (N, in_dim), jnp.float32)
    params = init_params(k_p, in_dim, out_dim)

    out = rencoder_forward(x, params)
    jax.block_until_ready(out)
    ref = rencoder_ref(x, params)
    assert out.shape == ref.shape == (N, out_dim)
    assert jnp.allclose(out, ref, atol=5e-5, rtol=5e-5), \
        float(jnp.max(jnp.abs(out - ref)))

    # Non-multiple-of-128 N exercises the masked edge block and a 2-step grid
    # (>= 2 steps so both v7x TensorCores get work).
    N2 = 300
    x2 = jax.random.normal(jax.random.PRNGKey(1), (N2, in_dim), jnp.float32)
    out2 = rencoder_forward(x2, params)
    jax.block_until_ready(out2)
    ref2 = rencoder_ref(x2, params)
    assert out2.shape == ref2.shape == (N2, out_dim)
    assert jnp.allclose(out2, ref2, atol=5e-5, rtol=5e-5), \
        float(jnp.max(jnp.abs(out2 - ref2)))

    print("KERNEL_OK")
</pallas_src>

<mosaic_0001>
module attributes {stable_mosaic.version = 11 : i64} {
  func.func @rencoder_kernel(%arg0: i32, %arg1: memref<3x128xf32, #tpu.memory_space<vmem>>, %arg2: memref<16x3xf32, #tpu.memory_space<vmem>>, %arg3: memref<16x1xf32, #tpu.memory_space<vmem>>, %arg4: memref<8x16xf32, #tpu.memory_space<vmem>>, %arg5: memref<8x1xf32, #tpu.memory_space<vmem>>, %arg6: memref<8x8xf32, #tpu.memory_space<vmem>>, %arg7: memref<8x1xf32, #tpu.memory_space<vmem>>, %arg8: memref<8x128xf32, #tpu.memory_space<vmem>>) attributes {dimension_semantics = [#tpu.dimension_semantics<parallel>], iteration_bounds = array<i64: 1>, scalar_prefetch = 0 : i64, scratch_operands = 0 : i64, tpu.core_type = #tpu.core_type<tc>, window_params = [{transform_indices = @transform_0, window_bounds = array<i64: 3, 128>}, {pipeline_mode = #tpu.pipeline_mode<synchronous>, transform_indices = @transform_1, window_bounds = array<i64: 16, 3>}, {pipeline_mode = #tpu.pipeline_mode<synchronous>, transform_indices = @transform_2, window_bounds = array<i64: 16, 1>}, {pipeline_mode = #tpu.pipeline_mode<synchronous>, transform_indices = @transform_3, window_bounds = array<i64: 8, 16>}, {pipeline_mode = #tpu.pipeline_mode<synchronous>, transform_indices = @transform_4, window_bounds = array<i64: 8, 1>}, {pipeline_mode = #tpu.pipeline_mode<synchronous>, transform_indices = @transform_5, window_bounds = array<i64: 8, 8>}, {pipeline_mode = #tpu.pipeline_mode<synchronous>, transform_indices = @transform_6, window_bounds = array<i64: 8, 1>}, {transform_indices = @transform_7, window_bounds = array<i64: 8, 128>}]} {
    %c0 = arith.constant 0 : index
    %c0_0 = arith.constant 0 : index
    %0 = vector.load %arg1[%c0, %c0_0] : memref<3x128xf32, #tpu.memory_space<vmem>>, vector<3x128xf32>
    %c0_1 = arith.constant 0 : index
    %c0_2 = arith.constant 0 : index
    %1 = vector.load %arg2[%c0_1, %c0_2] : memref<16x3xf32, #tpu.memory_space<vmem>>, vector<16x3xf32>
    %cst = arith.constant dense<0.000000e+00> : vector<16x128xf32>
    %2 = tpu.matmul %1, %0, %cst {dimension_numbers = #tpu.dot_dimension_numbers<[1], [0], [0], [1], [0, 0, 1, 1], [], []>} : vector<16x3xf32>, vector<3x128xf32>, vector<16x128xf32> -> vector<16x128xf32>
    %c0_3 = arith.constant 0 : index
    %c0_4 = arith.constant 0 : index
    %3 = vector.load %arg3[%c0_3, %c0_4] : memref<16x1xf32, #tpu.memory_space<vmem>>, vector<16x1xf32>
    %4 = vector.broadcast %3 : vector<16x1xf32> to vector<16x128xf32>
    %5 = arith.addf %2, %4 : vector<16x128xf32>
    %cst_5 = arith.constant 5.000000e-01 : f32
    %6 = vector.broadcast %cst_5 : f32 to vector<16x128xf32>
    %7 = arith.mulf %6, %5 : vector<16x128xf32>
    %8 = math.tanh %7 : vector<16x128xf32>
    %cst_6 = arith.constant 5.000000e-01 : f32
    %9 = vector.broadcast %cst_6 : f32 to vector<16x128xf32>
    %10 = arith.mulf %9, %8 : vector<16x128xf32>
    %cst_7 = arith.constant 5.000000e-01 : f32
    %11 = vector.broadcast %cst_7 : f32 to vector<16x128xf32>
    %12 = arith.addf %10, %11 : vector<16x128xf32>
    %c0_8 = arith.constant 0 : index
    %c0_9 = arith.constant 0 : index
    %13 = vector.load %arg4[%c0_8, %c0_9] : memref<8x16xf32, #tpu.memory_space<vmem>>, vector<8x16xf32>
    %cst_10 = arith.constant dense<0.000000e+00> : vector<8x128xf32>
    %14 = tpu.matmul %13, %12, %cst_10 {dimension_numbers = #tpu.dot_dimension_numbers<[1], [0], [0], [1], [0, 0, 1, 1], [], []>} : vector<8x16xf32>, vector<16x128xf32>, vector<8x128xf32> -> vector<8x128xf32>
    %c0_11 = arith.constant 0 : index
    %c0_12 = arith.constant 0 : index
    %15 = vector.load %arg5[%c0_11, %c0_12] : memref<8x1xf32, #tpu.memory_space<vmem>>, vector<8x1xf32>
    %16 = vector.broadcast %15 : vector<8x1xf32> to vector<8x128xf32>
    %17 = arith.addf %14, %16 : vector<8x128xf32>
    %cst_13 = arith.constant 5.000000e-01 : f32
    %18 = vector.broadcast %cst_13 : f32 to vector<8x128xf32>
    %19 = arith.mulf %18, %17 : vector<8x128xf32>
    %20 = math.tanh %19 : vector<8x128xf32>
    %cst_14 = arith.constant 5.000000e-01 : f32
    %21 = vector.broadcast %cst_14 : f32 to vector<8x128xf32>
    %22 = arith.mulf %21, %20 : vector<8x128xf32>
    %cst_15 = arith.constant 5.000000e-01 : f32
    %23 = vector.broadcast %cst_15 : f32 to vector<8x128xf32>
    %24 = arith.addf %22, %23 : vector<8x128xf32>
    %c0_16 = arith.constant 0 : index
    %c0_17 = arith.constant 0 : index
    %25 = vector.load %arg6[%c0_16, %c0_17] : memref<8x8xf32, #tpu.memory_space<vmem>>, vector<8x8xf32>
    %cst_18 = arith.constant dense<0.000000e+00> : vector<8x128xf32>
    %26 = tpu.matmul %25, %24, %cst_18 {dimension_numbers = #tpu.dot_dimension_numbers<[1], [0], [0], [1], [0, 0, 1, 1], [], []>} : vector<8x8xf32>, vector<8x128xf32>, vector<8x128xf32> -> vector<8x128xf32>
    %c0_19 = arith.constant 0 : index
    %c0_20 = arith.constant 0 : index
    %27 = vector.load %arg7[%c0_19, %c0_20] : memref<8x1xf32, #tpu.memory_space<vmem>>, vector<8x1xf32>
    %28 = vector.broadcast %27 : vector<8x1xf32> to vector<8x128xf32>
    %29 = arith.addf %26, %28 : vector<8x128xf32>
    %c0_21 = arith.constant 0 : index
    %c0_22 = arith.constant 0 : index
    %30 = vector.load %arg8[%c0_21, %c0_22] : memref<8x128xf32, #tpu.memory_space<vmem>>, vector<8x128xf32>
    tpu.vector_store %arg8[%c0_21, %c0_22], %29 {strides = array<i32>} : memref<8x128xf32, #tpu.memory_space<vmem>>, vector<8x128xf32>,
    return
  }
  func.func @transform_0(%arg0: i32) -> (i32, i32) {
    %c0_i32 = arith.constant 0 : i32
    %c0_i32_0 = arith.constant 0 : i32
    return %c0_i32, %arg0 : i32, i32
  }
  func.func @transform_1(%arg0: i32) -> (i32, i32) {
    %c0_i32 = arith.constant 0 : i32
    %c0_i32_0 = arith.constant 0 : i32
    %c0_i32_1 = arith.constant 0 : i32
    return %c0_i32, %c0_i32_0 : i32, i32
  }
  func.func @transform_2(%arg0: i32) -> (i32, i32) {
    %c0_i32 = arith.constant 0 : i32
    %c0_i32_0 = arith.constant 0 : i32
    %c0_i32_1 = arith.constant 0 : i32
    return %c0_i32, %c0_i32_0 : i32, i32
  }
  func.func @transform_3(%arg0: i32) -> (i32, i32) {
    %c0_i32 = arith.constant 0 : i32
    %c0_i32_0 = arith.constant 0 : i32
    %c0_i32_1 = arith.constant 0 : i32
    return %c0_i32, %c0_i32_0 : i32, i32
  }
  func.func @transform_4(%arg0: i32) -> (i32, i32) {
    %c0_i32 = arith.constant 0 : i32
    %c0_i32_0 = arith.constant 0 : i32
    %c0_i32_1 = arith.constant 0 : i32
    return %c0_i32, %c0_i32_0 : i32, i32
  }
  func.func @transform_5(%arg0: i32) -> (i32, i32) {
    %c0_i32 = arith.constant 0 : i32
    %c0_i32_0 = arith.constant 0 : i32
    %c0_i32_1 = arith.constant 0 : i32
    return %c0_i32, %c0_i32_0 : i32, i32
  }
  func.func @transform_6(%arg0: i32) -> (i32, i32) {
    %c0_i32 = arith.constant 0 : i32
    %c0_i32_0 = arith.constant 0 : i32
    %c0_i32_1 = arith.constant 0 : i32
    return %c0_i32, %c0_i32_0 : i32, i32
  }
  func.func @transform_7(%arg0: i32) -> (i32, i32) {
    %c0_i32 = arith.constant 0 : i32
    %c0_i32_0 = arith.constant 0 : i32
    return %c0_i32, %arg0 : i32, i32
  }
}

</mosaic_0001>

<bundles_post_ra>
// kernel: tpu_custom_call.1
= control target key start
LH: loop header
LB: loop body
LE: loop exit
PB: predicated region body
PF: predicated region fallthrough
CT: control target
= control target key end

     0   :  { %vm49_vm0 = vcmask 1042432   ;;  %vm42_vm1 = vcmask 23552   ;;  %s471_s0 = inlined_call_operand.vmem [shape: f32[3,16], index: 0, kind: input, shape index: {}]   ;;  %s472_s1 = inlined_call_operand.vmem [shape: f32[16,3], index: 1, kind: input, shape index: {}]   ;;  %s473_s2 = inlined_call_operand.vmem [shape: f32[16,1], index: 2, kind: input, shape index: {}]   ;;  %s474_s3 = inlined_call_operand.vmem [shape: f32[8,16], index: 3, kind: input, shape index: {}]   ;;  %s475_s4 = inlined_call_operand.vmem [shape: f32[8,1], index: 4, kind: input, shape index: {}]   ;;  %s476_s5 = inlined_call_operand.vmem [shape: f32[8,8], index: 5, kind: input, shape index: {}]   ;;  %s477_s6 = inlined_call_operand.vmem [shape: f32[8,1], index: 6, kind: input, shape index: {}]   ;;  %s478_s7 = inlined_call_operand.hbm [shape: f32[8,16], index: 7, kind: output, shape index: {}]  }
   0x1   :  { %v27_v0 = vld [vmem:[%s471_s0] sm:$0x7]  ;;  %v29_v2 = vld [vmem:[%s472_s1 + $0x8] sm:$0xff] }
   0x2   :  { %v28_v1 = vld [vmem:[%s472_s1] sm:$0xff]  ;;  %330 = vmatprep.subr.msk.mxu0 %vm49_vm0, %v27_v0 }
   0x3   :  { %332 = vmatprep.mubr.msk.f32.mxu0 %vm42_vm1, %v28_v1  ;;  %v30_v3 = vld [vmem:[%s473_s2] sm:$0xff] }
   0x4   :  { %12 = vsyncpa [#allocation3], 0  ;;  %331 = vmatpush3.msk.msra.mxu0 %vm49_vm0, %v27_v0  ;;  %v387_v4 = vmov 0   ;;  %v31_v5 = vld [vmem:[%s473_s2 + $0x8] sm:$0xff]  ;;  %v388_v6 = vmov 0.0|0.0   ;;  %vm389_vm2 = vmmov 0  }
   0x5   :  { %355 = vset.pattern.permute.xlu0 %v387_v4  ;;  %333 = vmatmul.mubr.msk.f32.vlgmr.msra.gmra.mrb[0].mxu0 %vm42_vm1, %v29_v2  ;;  %v390_v7 = vmov 0.0   ;;  %v137_v8 = vld [vmem:[%s475_s4] sm:$0xff]  ;;  %vm143_vm3 = vcmask 130048   ;;  %vm228_vm4 = vcmask 64512   ;;  %s391_s14 = smov [#allocation2]  }
   0x6   :  { %34 = vperm.xlu0 %355, %v30_v3   ;;  %356 = vset.pattern.permute.xlu1 %v387_v4  ;;  %v222_v9 = vld [vmem:[%s477_s6] sm:$0xff] }
   0x7   :  { %347 = vmatprep.subr.bf16.mxu1 %v388_v6  ;;  %339 = vmatprep.mubr.msk.f32.mxu1 %vm389_vm2, %v390_v7  ;;  %v136_v25 = vld [vmem:[%s474_s3] sm:$0xff]  ;;  %s309_s3 = sshll.u32 %s391_s14, 4  ;;  %s310_s3 = int_to_ptr.vmem [resolvable:$true] %s309_s3 }
   0x8   :  { %342 = vmatprep.subr.mxu0 %v390_v7  ;;  %344 = vmatprep.mubr.msk.f32.mxu0 %vm389_vm2, %v390_v7  ;;  %v221_v34 = vld [vmem:[%s476_s5] sm:$0xff]  ;;  %s363_s15 = scalar_lea.vmem %s310_s3, 128  ;;  %p368_p1 = scmp.lt.s32.totalorder %s310_s3, %s310_s3 }
   0x9   :  { %140 = vperm.xlu1 %356, %v137_v8   ;;  %p364_p0 = scmp.ne.s32.totalorder %s310_s3, %s363_s15  ;;  %p369_p2 = scmp.lt.s32.totalorder %s363_s15, %s363_s15 }
   0xa   :  { %39 = vperm.xlu0 %355, %v31_v5  }
   0xb   :  { %p370_p3 = por %p369_p2, %p368_p1 }
   0xd   :  { %225 = vperm.xlu1 %356, %v222_v9   ;;  %p371_p4 = pnand %p370_p3, %p364_p0 }
  0x85   :  { %v35_v10 = vpop.permute.xlu0 %34 }
  0x88   :  { %v141_v26 = vpop.permute.xlu1 %140 }
  0x89   :  { %v40_v11 = vpop.permute.xlu0 %39 }
  0x8c   :  { %v226_v35 = vpop.permute.xlu1 %225 }
  0xd8   :  { %v334_v12 = vpop.f32.mrb[0].mxu0 }
  0xd9   :  { %v125_v13 = vadd.f32 %v334_v12, %v40_v11  ;;  %v119_v14 = vpop.f32.mrb[1].mxu0 }
  0xda   :  { %v120_v15 = vadd.f32 %v119_v14, %v35_v10 }
  0xdb   :  { %v129_v16 = vmul.f32 0.5, %v125_v13 }
  0xdc   :  { %v128_v17 = vmul.f32 0.5, %v120_v15 }
  0xdd   :  { %357 = vtanh.f32 %v129_v16 }
  0xde   :  { %359 = vtanh.f32 %v128_v17 }
  0xe7   :  { %v358_v18 = vpop.eup %357 }
  0xe8   :  { %v360_v19 = vpop.eup %359  ;;  %v133_v20 = vmul.f32 0.5, %v358_v18 }
  0xe9   :  { %v132_v21 = vmul.f32 0.5, %v360_v19 }
  0xea   :  { %v135_v22 = vadd.f32 0.5, %v133_v20 }
  0xeb   :  { %v134_v23 = vadd.f32 0.5, %v132_v21 }
  0xed   :  { %v348_v24 = vpack.c.bf16 %v135_v22, %v134_v23 }
  0xef   :  { %349 = vmatpush3.bf16.msra.mxu1 %v348_v24 }
  0xf2   :  { %340 = vmatmul.mubr.msk.f32.vlgmr.msra.gmra.mrb[0].mxu1 %vm143_vm3, %v136_v25 }
 0x1c5   :  { %v213_v27 = vpop.f32.mrb[0].mxu1 }
 0x1c6   :  { %v214_v28 = vadd.f32 %v213_v27, %v141_v26  ;;  %v341_v29 = vpop.f32.mrb[1].mxu1 }
 0x1c8   :  { %v217_v30 = vmul.f32 0.5, %v214_v28 }
 0x1ca   :  { %361 = vtanh.f32 %v217_v30 }
 0x1d4   :  { %v362_v31 = vpop.eup %361 }
 0x1d5   :  { %v219_v32 = vmul.f32 0.5, %v362_v31 }
 0x1d7   :  { %v220_v33 = vadd.f32 0.5, %v219_v32 }
 0x1d9   :  { %343 = vmatpush3.msra.mxu0 %v220_v33 }
 0x1da   :  { %345 = vmatmul.mubr.msk.f32.vlgmr.msra.gmra.mrb[2].mxu0 %vm228_vm4, %v221_v34 }
 0x2ad   :  { %v298_v36 = vpop.f32.mrb[2].mxu0 }
 0x2ae   :  { %v299_v37 = vadd.f32 %v298_v36, %v226_v35  ;;  %v346_v38 = vpop.f32.mrb[3].mxu0 }
 0x2b0   :  { %302 = vst [vmem:[#allocation2] sm:$0xff] %v299_v37 }
 0x2b1   :  { %374 = shalt.err (!%p371_p4)
}
 0x2b2   :  { %s375_s17 = scalar_lea.hbm %s478_s7, 128 }
 0x2b3   :  { %p376_p5 = scmp.ne.s32.totalorder %s478_s7, %s375_s17  ;;  %p379_p6 = scmp.lt.u32.totalorder %s375_s17, %s478_s7 }
 0x2b5   :  { %p381_p7 = pnand %p379_p6, %p376_p5 }
 0x2b7   :  { %384 = shalt.err (!%p381_p7)
}
 0x2b8   :  { %312 = dma.vmem_to_hbm [thread:$0]  %s310_s3, 128, %s478_s7, [#allocation3]  }
 0x2b9   :  { %385 = dma.done.wait [#allocation3], 128  }
 0x2ba   :  { %386 = vsyncadd [#allocation3], 4294967168 }
 0x2bb   :  { %316 = vsyncpa [#allocation3], 1 }

</bundles_post_ra>
